<compile_context>
chip_gen: v5e
topology: v5e:2x2
jax: 0.10.0
libtpu: 0.0.40
codegen_flags: <defaults>
</compile_context>

<pallas_src>
import jax
import jax.numpy as jnp
from jax.experimental import pallas as pl
from jax.experimental.pallas import tpu as pltpu


def _round_up(n, m):
    return (n + m - 1) // m * m


def _cdiv(a, b):
    return (a + b - 1) // b


def walk_learner_kernel(x_ref, w1_ref, b1_ref, w2_ref, b2_ref, mask_ref, out_ref):
    # In-kernel cast to the MXU dtype (free VPU op; no extra wrapper pass over x).
    x = x_ref[...].astype(w1_ref.dtype)                            # [TB, obs_dim]

    # Layer 1, fused actor+critic: one matmul with N = 2*hidden = 256.
    h = jnp.dot(x, w1_ref[...], preferred_element_type=jnp.float32)
    h = jnp.maximum(h + b1_ref[...], 0.0)                          # f32 ReLU, [TB, 256]

    # Layer 2, block-diagonal fusion: one matmul, narrow (act_dim+1)-wide output.
    z = jnp.dot(h.astype(w2_ref.dtype), w2_ref[...],
                preferred_element_type=jnp.float32)
    z = z + b2_ref[...]                                            # [TB, act_dim+1] f32

    # tanh only on the actor lanes; critic lane passes through (mask is resident).
    out_ref[...] = jnp.where(mask_ref[...] > 0.0, jnp.tanh(z), z).astype(out_ref.dtype)


def pack_params(params, mxu_dtype=jnp.bfloat16):
    """Pack actor+critic weights once (fused layer-1, block-diagonal layer-2).

    Call this OUTSIDE the per-step forward path and reuse the result.
    """
    obs_dim, hidden = params["w1a"].shape
    act_dim = params["w2a"].shape[1]
    out_cols = act_dim + 1

    w1 = jnp.concatenate([params["w1a"], params["w1c"]], axis=1).astype(mxu_dtype)
    b1 = jnp.concatenate([params["b1a"], params["b1c"]], axis=1).astype(jnp.float32)

    w2 = jnp.zeros((2 * hidden, out_cols), jnp.float32)
    w2 = w2.at[:hidden, :act_dim].set(params["w2a"])
    w2 = w2.at[hidden:, act_dim:].set(params["w2c"])
    w2 = w2.astype(mxu_dtype)

    b2 = jnp.concatenate([params["b2a"], params["b2c"]], axis=1).astype(jnp.float32)

    # 1.0 on actor lanes, 0.0 on the critic lane.
    mask = jnp.concatenate(
        [jnp.ones((1, act_dim), jnp.float32), jnp.zeros((1, 1), jnp.float32)], axis=1)

    return dict(w1=w1, b1=b1, w2=w2, b2=b2, mask=mask,
                obs_dim=obs_dim, hidden=hidden, act_dim=act_dim)


def _vmem_limit_bytes(tb, obs_dim, hidden, out_cols, x_itemsize, w_itemsize):
    lane = lambda n: _round_up(n, 128)
    sub = lambda n: _round_up(n, 8)
    x_buf = tb * lane(obs_dim) * x_itemsize
    out_buf = tb * lane(out_cols) * 4
    w1_buf = sub(obs_dim) * lane(2 * hidden) * w_itemsize
    w2_buf = sub(2 * hidden) * lane(out_cols) * w_itemsize
    small = 8 * lane(2 * hidden) * 4 + 16 * lane(out_cols) * 4
    total = 2 * (x_buf + out_buf + w1_buf + w2_buf) + small + (4 << 20)
    return min(max(total, 8 << 20), 32 << 20)


def walk_learner_forward(x, packed, *, tb=None):
    """x: [B, obs_dim] f32. packed: output of pack_params().

    Returns (actor [B, act_dim], critic [B, 1])."""
    B, obs_dim = x.shape
    hidden = packed["hidden"]
    act_dim = packed["act_dim"]
    out_cols = act_dim + 1
    assert obs_dim == packed["obs_dim"]

    # Batch tile: large (amortize ~0.35us/step overhead), multiple of 8 sublanes,
    # capped at ~half the batch so the parallel grid has >=2 steps for v7x's 2 TCs.
    if tb is None:
        tb = min(2048, _round_up(_cdiv(B, 2), 8))
    tb = max(8, _round_up(tb, 8))
    grid = (_cdiv(B, tb),)   # no explicit padding; Pallas clips the ragged last tile

    vmem_limit = _vmem_limit_bytes(tb, obs_dim, hidden, out_cols,
                                   x.dtype.itemsize, packed["w1"].dtype.itemsize)

    out = pl.pallas_call(
        walk_learner_kernel,
        out_shape=jax.ShapeDtypeStruct((B, out_cols), jnp.float32),
        grid=grid,
        in_specs=[
            pl.BlockSpec((tb, obs_dim), lambda i: (i, 0)),          # x: tiled over batch
            pl.BlockSpec((obs_dim, 2 * hidden), lambda i: (0, 0)),  # fused W1 (resident)
            pl.BlockSpec((1, 2 * hidden), lambda i: (0, 0)),        # fused b1
            pl.BlockSpec((2 * hidden, out_cols), lambda i: (0, 0)), # block-diag W2
            pl.BlockSpec((1, out_cols), lambda i: (0, 0)),          # fused b2
            pl.BlockSpec((1, out_cols), lambda i: (0, 0)),          # actor-lane mask
        ],
        out_specs=pl.BlockSpec((tb, out_cols), lambda i: (i, 0)),
        compiler_params=pltpu.CompilerParams(
            dimension_semantics=("parallel",),   # batch axis shards across TCs on v7x
            vmem_limit_bytes=vmem_limit,
        ),
    )(x, packed["w1"], packed["b1"], packed["w2"], packed["b2"], packed["mask"])

    actor = out[:, :act_dim]
    critic = out[:, act_dim:act_dim + 1]
    return actor, critic


def init_params(key, obs_dim, act_dim, hidden=128):
    """Deterministic synthetic init (uniform, scaled like PyTorch's default Linear init)."""
    ks = jax.random.split(key, 8)

    def lin(kw, kb, fan_in, fan_out):
        bound = 1.0 / jnp.sqrt(fan_in)
        w = jax.random.uniform(kw, (fan_in, fan_out), jnp.float32, -bound, bound)
        b = jax.random.uniform(kb, (1, fan_out), jnp.float32, -bound, bound)
        return w, b

    w1a, b1a = lin(ks[0], ks[1], obs_dim, hidden)
    w2a, b2a = lin(ks[2], ks[3], hidden, act_dim)
    w1c, b1c = lin(ks[4], ks[5], obs_dim, hidden)
    w2c, b2c = lin(ks[6], ks[7], hidden, 1)
    return dict(w1a=w1a, b1a=b1a, w2a=w2a, b2a=b2a,
                w1c=w1c, b1c=b1c, w2c=w2c, b2c=b2c)


def reference_forward(x, p):
    h_a = jnp.maximum(x @ p["w1a"] + p["b1a"], 0.0)
    actor = jnp.tanh(h_a @ p["w2a"] + p["b2a"])
    h_c = jnp.maximum(x @ p["w1c"] + p["b1c"], 0.0)
    critic = h_c @ p["w2c"] + p["b2c"]
    return actor, critic


if __name__ == "__main__":
    B, OBS_DIM, ACT_DIM = 8, 32, 8

    key = jax.random.PRNGKey(0)
    k_x, k_p = jax.random.split(key)
    x = jax.random.normal(k_x, (B, OBS_DIM), dtype=jnp.float32)
    params = init_params(k_p, OBS_DIM, ACT_DIM)

    actor_ref, critic_ref = reference_forward(x, params)

    # f32 weight path — matches the JAX reference tightly (same default MXU precision).
    packed_f32 = jax.tree_util.tree_map(
        lambda a: jax.block_until_ready(a), pack_params(params, mxu_dtype=jnp.float32))
    actor, critic = walk_learner_forward(x, packed_f32)
    jax.block_until_ready((actor, critic))
    assert actor.shape == (B, ACT_DIM) and critic.shape == (B, 1)
    assert jnp.allclose(actor, actor_ref, atol=1e-5, rtol=1e-5)
    assert jnp.allclose(critic, critic_ref, atol=1e-5, rtol=1e-5)

    # Default bf16-MXU path (v5e/v6e/v7x fast path) — f32 accumulation, looser tolerance.
    packed_bf16 = pack_params(params)   # pack once, reuse across forward calls
    actor_bf, critic_bf = walk_learner_forward(x, packed_bf16)
    jax.block_until_ready((actor_bf, critic_bf))
    assert jnp.allclose(actor_bf, actor_ref, atol=5e-2, rtol=5e-2)
    assert jnp.allclose(critic_bf, critic_ref, atol=5e-2, rtol=5e-2)

    # Ragged batch (B not a multiple of the tile): no host-side padding, grid=cdiv.
    B2 = 12
    x2 = jax.random.normal(jax.random.PRNGKey(1), (B2, OBS_DIM), dtype=jnp.float32)
    a2_ref, c2_ref = reference_forward(x2, params)
    a2, c2 = walk_learner_forward(x2, packed_bf16)
    jax.block_until_ready((a2, c2))
    assert a2.shape == (B2, ACT_DIM) and c2.shape == (B2, 1)
    assert jnp.allclose(a2, a2_ref, atol=5e-2, rtol=5e-2)
    assert jnp.allclose(c2, c2_ref, atol=5e-2, rtol=5e-2)

    print("KERNEL_OK")
</pallas_src>

<mosaic_0001>
module attributes {stable_mosaic.version = 11 : i64} {
  func.func @walk_learner_kernel(%arg0: i32, %arg1: memref<8x32xf32, #tpu.memory_space<vmem>>, %arg2: memref<32x256xf32, #tpu.memory_space<vmem>>, %arg3: memref<1x256xf32, #tpu.memory_space<vmem>>, %arg4: memref<256x9xf32, #tpu.memory_space<vmem>>, %arg5: memref<1x9xf32, #tpu.memory_space<vmem>>, %arg6: memref<1x9xf32, #tpu.memory_space<vmem>>, %arg7: memref<8x9xf32, #tpu.memory_space<vmem>>) attributes {dimension_semantics = [#tpu.dimension_semantics<parallel>], iteration_bounds = array<i64: 1>, scalar_prefetch = 0 : i64, scratch_operands = 0 : i64, tpu.core_type = #tpu.core_type<tc>, window_params = [{transform_indices = @transform_0, window_bounds = array<i64: 8, 32>}, {pipeline_mode = #tpu.pipeline_mode<synchronous>, transform_indices = @transform_1, window_bounds = array<i64: 32, 256>}, {pipeline_mode = #tpu.pipeline_mode<synchronous>, transform_indices = @transform_2, window_bounds = array<i64: 1, 256>}, {pipeline_mode = #tpu.pipeline_mode<synchronous>, transform_indices = @transform_3, window_bounds = array<i64: 256, 9>}, {pipeline_mode = #tpu.pipeline_mode<synchronous>, transform_indices = @transform_4, window_bounds = array<i64: 1, 9>}, {pipeline_mode = #tpu.pipeline_mode<synchronous>, transform_indices = @transform_5, window_bounds = array<i64: 1, 9>}, {transform_indices = @transform_6, window_bounds = array<i64: 8, 9>}]} {
    %c0 = arith.constant 0 : index
    %c0_0 = arith.constant 0 : index
    %0 = vector.load %arg1[%c0, %c0_0] : memref<8x32xf32, #tpu.memory_space<vmem>>, vector<8x32xf32>
    %c0_1 = arith.constant 0 : index
    %c0_2 = arith.constant 0 : index
    %1 = vector.load %arg2[%c0_1, %c0_2] : memref<32x256xf32, #tpu.memory_space<vmem>>, vector<32x256xf32>
    %cst = arith.constant dense<0.000000e+00> : vector<8x256xf32>
    %2 = tpu.matmul %0, %1, %cst {dimension_numbers = #tpu.dot_dimension_numbers<[1], [0], [0], [1], [0, 0, 1, 1], [], []>} : vector<8x32xf32>, vector<32x256xf32>, vector<8x256xf32> -> vector<8x256xf32>
    %c0_3 = arith.constant 0 : index
    %c0_4 = arith.constant 0 : index
    %3 = vector.load %arg3[%c0_3, %c0_4] : memref<1x256xf32, #tpu.memory_space<vmem>>, vector<1x256xf32>
    %4 = vector.broadcast %3 : vector<1x256xf32> to vector<8x256xf32>
    %5 = arith.addf %2, %4 : vector<8x256xf32>
    %cst_5 = arith.constant 0.000000e+00 : f32
    %6 = vector.broadcast %cst_5 : f32 to vector<8x256xf32>
    %7 = arith.maximumf %5, %6 : vector<8x256xf32>
    %c0_6 = arith.constant 0 : index
    %c0_7 = arith.constant 0 : index
    %8 = vector.load %arg4[%c0_6, %c0_7] : memref<256x9xf32, #tpu.memory_space<vmem>>, vector<256x9xf32>
    %cst_8 = arith.constant dense<0.000000e+00> : vector<8x9xf32>
    %9 = tpu.matmul %7, %8, %cst_8 {dimension_numbers = #tpu.dot_dimension_numbers<[1], [0], [0], [1], [0, 0, 1, 1], [], []>} : vector<8x256xf32>, vector<256x9xf32>, vector<8x9xf32> -> vector<8x9xf32>
    %c0_9 = arith.constant 0 : index
    %c0_10 = arith.constant 0 : index
    %10 = vector.load %arg5[%c0_9, %c0_10] : memref<1x9xf32, #tpu.memory_space<vmem>>, vector<1x9xf32>
    %11 = vector.broadcast %10 : vector<1x9xf32> to vector<8x9xf32>
    %12 = arith.addf %9, %11 : vector<8x9xf32>
    %c0_11 = arith.constant 0 : index
    %c0_12 = arith.constant 0 : index
    %13 = vector.load %arg6[%c0_11, %c0_12] : memref<1x9xf32, #tpu.memory_space<vmem>>, vector<1x9xf32>
    %cst_13 = arith.constant 0.000000e+00 : f32
    %14 = vector.broadcast %cst_13 : f32 to vector<1x9xf32>
    %15 = arith.cmpf ogt, %13, %14 : vector<1x9xf32>
    %16 = math.tanh %12 : vector<8x9xf32>
    %17 = vector.shape_cast %15 : vector<1x9xi1> to vector<1x9xi1>
    %18 = vector.broadcast %17 : vector<1x9xi1> to vector<8x9xi1>
    %19 = arith.select %18, %16, %12 : vector<8x9xi1>, vector<8x9xf32>
    %c0_14 = arith.constant 0 : index
    %c0_15 = arith.constant 0 : index
    %20 = vector.load %arg7[%c0_14, %c0_15] : memref<8x9xf32, #tpu.memory_space<vmem>>, vector<8x9xf32>
    tpu.vector_store %arg7[%c0_14, %c0_15], %19 {strides = array<i32>} : memref<8x9xf32, #tpu.memory_space<vmem>>, vector<8x9xf32>,
    return
  }
  func.func @transform_0(%arg0: i32) -> (i32, i32) {
    %c0_i32 = arith.constant 0 : i32
    %c0_i32_0 = arith.constant 0 : i32
    return %arg0, %c0_i32 : i32, i32
  }
  func.func @transform_1(%arg0: i32) -> (i32, i32) {
    %c0_i32 = arith.constant 0 : i32
    %c0_i32_0 = arith.constant 0 : i32
    %c0_i32_1 = arith.constant 0 : i32
    return %c0_i32, %c0_i32_0 : i32, i32
  }
  func.func @transform_2(%arg0: i32) -> (i32, i32) {
    %c0_i32 = arith.constant 0 : i32
    %c0_i32_0 = arith.constant 0 : i32
    %c0_i32_1 = arith.constant 0 : i32
    return %c0_i32, %c0_i32_0 : i32, i32
  }
  func.func @transform_3(%arg0: i32) -> (i32, i32) {
    %c0_i32 = arith.constant 0 : i32
    %c0_i32_0 = arith.constant 0 : i32
    %c0_i32_1 = arith.constant 0 : i32
    return %c0_i32, %c0_i32_0 : i32, i32
  }
  func.func @transform_4(%arg0: i32) -> (i32, i32) {
    %c0_i32 = arith.constant 0 : i32
    %c0_i32_0 = arith.constant 0 : i32
    %c0_i32_1 = arith.constant 0 : i32
    return %c0_i32, %c0_i32_0 : i32, i32
  }
  func.func @transform_5(%arg0: i32) -> (i32, i32) {
    %c0_i32 = arith.constant 0 : i32
    %c0_i32_0 = arith.constant 0 : i32
    %c0_i32_1 = arith.constant 0 : i32
    return %c0_i32, %c0_i32_0 : i32, i32
  }
  func.func @transform_6(%arg0: i32) -> (i32, i32) {
    %c0_i32 = arith.constant 0 : i32
    %c0_i32_0 = arith.constant 0 : i32
    return %arg0, %c0_i32 : i32, i32
  }
}

</mosaic_0001>

<bundles_post_ra>
// kernel: tpu_custom_call.1
= control target key start
LH: loop header
LB: loop body
LE: loop exit
PB: predicated region body
PF: predicated region fallthrough
CT: control target
= control target key end

     0   :  { %vm39_vm0 = vcmask 261120   ;;  %s391_s0 = inlined_call_operand.vmem [shape: f32[8,32], index: 0, kind: input, shape index: {}]   ;;  %s392_s1 = inlined_call_operand.vmem [shape: f32[32,256], index: 1, kind: input, shape index: {}]   ;;  %s393_s2 = inlined_call_operand.vmem [shape: f32[1,256], index: 2, kind: input, shape index: {}]   ;;  %s394_s3 = inlined_call_operand.vmem [shape: f32[256,9], index: 3, kind: input, shape index: {}]   ;;  %s395_s4 = inlined_call_operand.vmem [shape: f32[1,9], index: 4, kind: input, shape index: {}]   ;;  %s396_s5 = inlined_call_operand.vmem [shape: f32[1,9], index: 5, kind: input, shape index: {}]   ;;  %s397_s6 = inlined_call_operand.hbm [shape: f32[8,9], index: 6, kind: output, shape index: {}]  }
   0x1   :  { %v31_v0 = vld [vmem:[%s392_s1 + $0x30] sm:$0xff]  ;;  %v29_v1 = vld [vmem:[%s392_s1 + $0x20] sm:$0xff]  ;;  %v32_v2 = vld [vmem:[%s392_s1 + $0x38] sm:$0xff] }
   0x2   :  { %55 = vmatpush.msra.mxu0 %v31_v0  ;;  %75 = vmatpush.msra.mxu1 %v32_v2  ;;  %v30_v3 = vld [vmem:[%s392_s1 + $0x28] sm:$0xff]  ;;  %v27_v4 = vld [vmem:[%s392_s1 + $0x10] sm:$0xff]  ;;  %v28_v5 = vld [vmem:[%s392_s1 + $0x18] sm:$0xff] }
   0x3   :  { %v100_v6 = vld [vmem:[%s394_s3 + $0x78] sm:$0xff]  ;;  %v99_v7 = vld [vmem:[%s394_s3 + $0x70] sm:$0xff]  ;;  %v25_v9 = vld [vmem:[%s392_s1] sm:$0xff] }
   0x4   :  { %56 = vmatpush.msra.mxu0 %v29_v1  ;;  %76 = vmatpush.msra.mxu1 %v30_v3  ;;  %v116_v8 = vld [vmem:[%s394_s3 + $0xf8] sm:$0xff]  ;;  %v26_v10 = vld [vmem:[%s392_s1 + $0x8] sm:$0xff]  ;;  %v115_v11 = vld [vmem:[%s394_s3 + $0xf0] sm:$0xff] }
   0x5   :  { %121 = vmatpush.msra.mxu2 %v100_v6  ;;  %141 = vmatpush.msra.mxu3 %v116_v8  ;;  %v24_v12 = vld [vmem:[%s391_s0] sm:$0xff]  ;;  %v98_v13 = vld [vmem:[%s394_s3 + $0x68] sm:$0xff]  ;;  %v96_v17 = vld [vmem:[%s394_s3 + $0x58] sm:$0xff] }
   0x6   :  { %57 = vmatpush.msra.mxu0 %v27_v4  ;;  %77 = vmatpush.msra.mxu1 %v28_v5  ;;  %v114_v14 = vld [vmem:[%s394_s3 + $0xe8] sm:$0xff]  ;;  %v97_v15 = vld [vmem:[%s394_s3 + $0x60] sm:$0xff]  ;;  %v112_v18 = vld [vmem:[%s394_s3 + $0xd8] sm:$0xff] }
   0x7   :  { %122 = vmatpush.msra.mxu2 %v99_v7  ;;  %142 = vmatpush.msra.mxu3 %v115_v11  ;;  %v113_v16 = vld [vmem:[%s394_s3 + $0xe0] sm:$0xff]  ;;  %v95_v19 = vld [vmem:[%s394_s3 + $0x50] sm:$0xff] }
   0x8   :  { %58 = vmatpush.msra.mxu0 %v25_v9  ;;  %78 = vmatpush.msra.mxu1 %v26_v10  ;;  %v111_v20 = vld [vmem:[%s394_s3 + $0xd0] sm:$0xff] }
   0x9   :  { %186 = vmatmul.msk.f32.vlgmr.msra.gmra.mxu0 %vm39_vm0, %v24_v12  ;;  %187 = vmatmul.msk.f32.vlgmr.msra.gmra.mxu1 %vm39_vm0, %v24_v12 }
   0xa   :  { %123 = vmatpush.msra.mxu2 %v98_v13  ;;  %143 = vmatpush.msra.mxu3 %v114_v14 }
   0xc   :  { %124 = vmatpush.msra.mxu2 %v97_v15  ;;  %144 = vmatpush.msra.mxu3 %v113_v16 }
   0xd   :  { %11 = vsyncpa [#allocation3], 0  ;;  %v94_v21 = vld [vmem:[%s394_s3 + $0x48] sm:$0xff]  ;;  %v93_v23 = vld [vmem:[%s394_s3 + $0x40] sm:$0xff]  ;;  %v219_v55 = vmov 0   ;;  %s177_s9 = sshll.u32 %s397_s6, 4  ;;  %s178_s9 = int_to_ptr.hbm [resolvable:$true] %s177_s9 }
   0xe   :  { %125 = vmatpush.msra.mxu2 %v96_v17  ;;  %145 = vmatpush.msra.mxu3 %v112_v18  ;;  %v110_v22 = vld [vmem:[%s394_s3 + $0xc8] sm:$0xff]  ;;  %v109_v24 = vld [vmem:[%s394_s3 + $0xc0] sm:$0xff]  ;;  %v92_v25 = vld [vmem:[%s394_s3 + $0x38] sm:$0xff]  ;;  %vm168_vm3 = vcmask 72704  }
   0xf   :  { %v108_v26 = vld [vmem:[%s394_s3 + $0xb8] sm:$0xff]  ;;  %v91_v27 = vld [vmem:[%s394_s3 + $0x30] sm:$0xff]  ;;  %v90_v29 = vld [vmem:[%s394_s3 + $0x28] sm:$0xff] }
  0x10   :  { %126 = vmatpush.msra.mxu2 %v95_v19  ;;  %146 = vmatpush.msra.mxu3 %v111_v20  ;;  %v107_v28 = vld [vmem:[%s394_s3 + $0xb0] sm:$0xff]  ;;  %v106_v30 = vld [vmem:[%s394_s3 + $0xa8] sm:$0xff]  ;;  %v89_v31 = vld [vmem:[%s394_s3 + $0x20] sm:$0xff] }
  0x11   :  { %v105_v32 = vld [vmem:[%s394_s3 + $0xa0] sm:$0xff]  ;;  %v88_v33 = vld [vmem:[%s394_s3 + $0x18] sm:$0xff]  ;;  %v87_v34 = vld [vmem:[%s394_s3 + $0x10] sm:$0xff] }
  0x12   :  { %127 = vmatpush.msra.mxu2 %v94_v21  ;;  %147 = vmatpush.msra.mxu3 %v110_v22  ;;  %v104_v35 = vld [vmem:[%s394_s3 + $0x98] sm:$0xff]  ;;  %v86_v36 = vld [vmem:[%s394_s3 + $0x8] sm:$0xff]  ;;  %v103_v37 = vld [vmem:[%s394_s3 + $0x90] sm:$0xff] }
  0x13   :  { %v85_v38 = vld [vmem:[%s394_s3] sm:$0xff]  ;;  %v102_v39 = vld [vmem:[%s394_s3 + $0x88] sm:$0xff] }
  0x14   :  { %128 = vmatpush.msra.mxu2 %v93_v23  ;;  %148 = vmatpush.msra.mxu3 %v109_v24  ;;  %v101_v40 = vld [vmem:[%s394_s3 + $0x80] sm:$0xff] }
  0x15   :  { %v33_v41 = vld [vmem:[%s393_s2] sm:$0x3]  ;;  %s220_s2 = smov [#allocation2]  }
  0x16   :  { %129 = vmatpush.msra.mxu2 %v92_v25  ;;  %149 = vmatpush.msra.mxu3 %v108_v26  ;;  %v35_v42 = vperm.slane %v33_v41, 0  ;;  %v36_v43 = vperm.slane %v33_v41, 1  ;;  %v161_v50 = vld [vmem:[%s396_s5] sm:$0x1]  ;;  %s175_s30 = sshll.u32 %s220_s2, 4  ;;  %s176_s30 = int_to_ptr.vmem [resolvable:$true] %s175_s30 }
  0x17   :  { %v190_v51 = vld [vmem:[%s395_s4] ss:$0 sm:$0xff]  ;;  %vm162_vm1 = vcmp.gt.f32.partialorder %v161_v50, 0.0 }
  0x18   :  { %130 = vmatpush.msra.mxu2 %v91_v27  ;;  %150 = vmatpush.msra.mxu3 %v107_v28  ;;  %v164_v56 = vsel %vm162_vm1, 1, %v219_v55 }
  0x19   :  { %v165_v58 = vperm.slane %v164_v56, 0 }
  0x1a   :  { %131 = vmatpush.msra.mxu2 %v90_v29  ;;  %151 = vmatpush.msra.mxu3 %v106_v30 }
  0x1b   :  { %vm166_vm2 = vcmp.eq.s32.totalorder %v165_v58, 1 }
  0x1c   :  { %132 = vmatpush.msra.mxu2 %v89_v31  ;;  %152 = vmatpush.msra.mxu3 %v105_v32 }
  0x1e   :  { %133 = vmatpush.msra.mxu2 %v88_v33  ;;  %153 = vmatpush.msra.mxu3 %v104_v35 }
  0x20   :  { %134 = vmatpush.msra.mxu2 %v87_v34  ;;  %154 = vmatpush.msra.mxu3 %v103_v37 }
  0x22   :  { %135 = vmatpush.msra.mxu2 %v86_v36  ;;  %155 = vmatpush.msra.mxu3 %v102_v39 }
  0x24   :  { %136 = vmatpush.msra.mxu2 %v85_v38  ;;  %156 = vmatpush.msra.mxu3 %v101_v40 }
  0x86   :  { %v60_v44 = vpop.f32.mrf.mxu0  ;;  %v80_v45 = vpop.f32.mrf.mxu1 }
  0x87   :  { %v61_v46 = vadd.f32 %v60_v44, %v35_v42  ;;  %v81_v47 = vadd.f32 %v80_v45, %v36_v43 }
  0x89   :  { %v83_v48 = vmax.f32 %v61_v46, 0.0  ;;  %v84_v49 = vmax.f32 %v81_v47, 0.0 }
  0x8b   :  { %137 = vmatmul.f32.vlgmr.msra.gmra.mxu2 %v83_v48  ;;  %157 = vmatmul.f32.vlgmr.msra.gmra.mxu3 %v84_v49 }
 0x10e   :  { %v138_v52 = vpop.f32.mrf.mxu2  ;;  %v158_v53 = vpop.f32.mrf.mxu3 }
 0x10f   :  { %v139_v54 = vadd.f32 %v190_v51, %v138_v52 }
 0x111   :  { %v159_v57 = vadd.f32 %v158_v53, %v139_v54 }
 0x113   :  { %191 = vtanh.f32 %v159_v57 }
 0x119   :  { %v192_v59 = vpop.eup %191 }
 0x11a   :  { %v167_v60 = vsel %vm166_vm2, %v192_v59, %v159_v57 }
 0x11b   :  { %169 = vst.msk [vmem:[#allocation2] sm:$0xff] %vm168_vm3, %v167_v60 }
 0x11c   :  { %180 = dma.vmem_to_hbm [thread:$0]  %s176_s30, 128, %s178_s9, [#allocation3]  }
 0x11d   :  { %217 = dma.done.wait [#allocation3], 128  }
 0x11e   :  { %218 = vsyncadd [#allocation3], 4294967168 }
 0x11f   :  { %185 = vsyncpa [#allocation3], 1 }

</bundles_post_ra>
